<compile_context>
chip_gen: v7x
topology: tpu7x:2x2x1
jax: 0.10.0
libtpu: 0.0.40
codegen_flags: <defaults>
</compile_context>

<pallas_src>
import jax
import jax.numpy as jnp
from jax.experimental import pallas as pl
from jax.experimental.pallas import tpu as pltpu


def _round_up(x, m):
    return (x + m - 1) // m * m


# ---------------------------------------------------------------------------
# Pallas kernel: fused energy -> softmax -> weighted context
# ---------------------------------------------------------------------------
def _attn_kernel(v_ref, enc_ref, ctx_ref, alpha_ref):
    # v_ref    : (TB, 1, N)  projected hidden (hidden @ W), compute dtype
    # enc_ref  : (TB, T, N)  encoder outputs (unpadded), compute dtype
    # ctx_ref  : (TB, 1, N)  weighted context (output, model dtype)
    # alpha_ref: (TB, T, 1)  attention weights (output, f32)
    v = v_ref[...]                                        # (TB, 1, N)
    enc = enc_ref[...]                                    # (TB, T, N)

    # energy[b, t] = <v[b], enc[b, t]>
    # VPU broadcast-multiply (v's unit sublane dim broadcasts over T for free)
    # + f32 lane-axis accumulate.  No MXU M=1 pushes, no enc transposes.
    prod = (v * enc).astype(jnp.float32)                  # (TB, T, N) f32
    energy = jnp.sum(prod, axis=-1, keepdims=True)        # (TB, T, 1) f32

    # Numerically stable softmax over T (== F.softmax(energy, dim=1) on (B, T)).
    m = jnp.max(energy, axis=1, keepdims=True)            # (TB, 1, 1)
    p = jnp.exp(energy - m)                               # (TB, T, 1)
    denom = jnp.sum(p, axis=1, keepdims=True)             # (TB, 1, 1)
    # EUP reciprocal (frees VALU slots; use approx=False for strict softmax parity).
    alpha = p * pl.reciprocal(denom, approx=True)         # (TB, T, 1) f32
    alpha_ref[...] = alpha

    # ctx[b, n] = sum_t alpha[b, t] * enc[b, t, n]
    # alpha's unit lane dim broadcasts over N for free; f32 sublane-axis accumulate.
    weighted = (alpha.astype(enc.dtype) * enc).astype(jnp.float32)   # (TB, T, N) f32
    ctx = jnp.sum(weighted, axis=1, keepdims=True)        # (TB, 1, N) f32
    ctx_ref[...] = ctx.astype(ctx_ref.dtype)


def attn_general(hidden, encoder_outputs, w, *, block_b=128, compute_dtype=None):
    """Attn(method='general').

    hidden:          (B, N)
    encoder_outputs: (B, T, N)
    w:               (N, N)  nn.Linear(N, N, bias=False) weight (out x in)
    returns (weighted_context (B, N), alpha (B, T) in f32)
    """
    B, N = hidden.shape
    _, T, _ = encoder_outputs.shape
    out_dtype = hidden.dtype
    if compute_dtype is None:
        compute_dtype = encoder_outputs.dtype   # pass jnp.bfloat16 to halve enc DMA bytes

    # (perf) Hoist hidden @ W: one full-width MXU matmul in the wrapper.
    #   energy[b,t] = <enc[b,t] @ W^T, hidden[b]> = <enc[b,t], hidden[b] @ W>
    # Done in the compute dtype with f32 accumulation (consistent bf16/f32 precision).
    v = jnp.dot(hidden.astype(compute_dtype), w.astype(compute_dtype),
                preferred_element_type=jnp.float32).astype(compute_dtype)   # (B, N)
    enc = encoder_outputs.astype(compute_dtype)

    # --- batch blocking, sized against a per-generation VMEM budget ---------------
    Tt = _round_up(T, 8)          # physical sublane padding of the enc / alpha tiles
    Nt = _round_up(N, 128)        # physical lane padding of the enc / v / ctx tiles
    esize = jnp.dtype(compute_dtype).itemsize
    osize = jnp.dtype(out_dtype).itemsize

    def vmem_need(tb):
        io = 2 * tb * (Tt * Nt * esize           # enc block (double-buffered)
                       + 8 * Nt * esize          # v block
                       + 8 * Nt * osize          # ctx block
                       + Tt * 128 * 4)           # alpha block
        scratch = 2 * tb * Tt * Nt * 4           # in-kernel f32 products
        return io + scratch

    try:
        vmem_cap = int(pltpu.get_tpu_info().vmem_capacity_bytes)
    except Exception:  # pragma: no cover - conservative fallback (v7x per-TC VMEM)
        vmem_cap = 64 << 20
    budget = (3 * vmem_cap) // 4                 # leave headroom under physical VMEM

    TB = max(1, min(int(block_b), B))
    while TB > 1 and vmem_need(TB) > budget:
        TB //= 2
    # TODO(synk): if even TB == 1 exceeds the budget (huge T*N), a T-tiled grid axis
    # with online-softmax accumulators is required; not needed at these sizes.

    Bp = _round_up(B, TB)
    if Bp != B:
        # Only the (cheap) batch dim is padded; padded rows give a uniform softmax
        # over real T (no -inf rows) and are sliced off below.
        v = jnp.zeros((Bp, N), compute_dtype).at[:B].set(v)
        enc = jnp.zeros((Bp, T, N), compute_dtype).at[:B].set(enc)
    v3 = v[:, None, :]                           # (Bp, 1, N)

    grid = (Bp // TB,)

    cp_kwargs = dict(dimension_semantics=("parallel",))
    need = vmem_need(TB)
    if need > (12 << 20):   # v5e's default scoped limit is 16 MiB; don't rely on it
        cp_kwargs["vmem_limit_bytes"] = int(min(need + (4 << 20), budget))

    ctx_p, alpha_p = pl.pallas_call(
        _attn_kernel,
        out_shape=(
            jax.ShapeDtypeStruct((Bp, 1, N), out_dtype),      # weighted_context
            jax.ShapeDtypeStruct((Bp, T, 1), jnp.float32),    # alpha (f32)
        ),
        grid_spec=pltpu.PrefetchScalarGridSpec(
            num_scalar_prefetch=0,
            grid=grid,
            in_specs=[
                pl.BlockSpec((TB, 1, N), lambda i: (i, 0, 0)),
                pl.BlockSpec((TB, T, N), lambda i: (i, 0, 0)),
            ],
            out_specs=[
                pl.BlockSpec((TB, 1, N), lambda i: (i, 0, 0)),
                pl.BlockSpec((TB, T, 1), lambda i: (i, 0, 0)),
            ],
        ),
        compiler_params=pltpu.CompilerParams(**cp_kwargs),
    )(v3, enc)

    weighted_context = ctx_p[:B, 0, :]
    alpha = alpha_p[:B, :, 0]
    return weighted_context, alpha


# ---------------------------------------------------------------------------
# Pure-JAX reference for the attention core (mirrors the PyTorch forward)
# ---------------------------------------------------------------------------
def attn_general_ref(hidden, encoder_outputs, w):
    energy = jnp.einsum('btk,nk->btn', encoder_outputs, w)
    energy = jnp.einsum('btn,bn->bt', energy, hidden)
    alpha = jax.nn.softmax(energy, axis=-1)
    ctx = jnp.einsum('bt,btn->bn', alpha, encoder_outputs)
    return ctx, alpha


# ---------------------------------------------------------------------------
# Full RNNAttnDecoder forward (attn_model='general', num_rnn_layers=1).
# Dense GRU / embedding / Wc / Ws layers stay in XLA (full-width matmuls);
# the attention core runs the Pallas kernel above.
# ---------------------------------------------------------------------------
def _gru_cell(x, h, w_ih, w_hh, b_ih, b_hh):
    # PyTorch nn.GRU single step; gate order in the stacked weights is (r, z, n).
    H = h.shape[-1]
    gi = x @ w_ih.T + b_ih
    gh = h @ w_hh.T + b_hh
    i_r, i_z, i_n = gi[:, :H], gi[:, H:2 * H], gi[:, 2 * H:]
    h_r, h_z, h_n = gh[:, :H], gh[:, H:2 * H], gh[:, 2 * H:]
    r = jax.nn.sigmoid(i_r + h_r)
    z = jax.nn.sigmoid(i_z + h_z)
    n = jnp.tanh(i_n + r * h_n)
    return (1.0 - z) * n + z * h


def rnn_attn_decoder_forward(params, token_ids, last_ht, last_hidden,
                             encoder_outputs, *, attn_fn=attn_general):
    """token_ids (B,) int; last_ht (B,H); last_hidden (1,B,H); enc (B,T,H)."""
    embed = params['embedding'][token_ids]                  # fixed identity embedding
    rnn_input = jnp.concatenate([embed, last_ht], axis=1)   # (B, V + H)
    h_new = _gru_cell(rnn_input, last_hidden[0],
                      params['w_ih'], params['w_hh'],
                      params['b_ih'], params['b_hh'])       # (B, H)
    output = h_new                                          # 1 layer, 1 step
    weighted_context, alpha = attn_fn(output, encoder_outputs, params['w_attn'])
    ht = jnp.tanh(jnp.concatenate([output, weighted_context], axis=1)
                  @ params['w_wc'].T + params['b_wc'])
    logits = ht @ params['w_ws'].T + params['b_ws']
    hidden = h_new[None]                                    # (1, B, H)
    return logits, ht, hidden, alpha


if __name__ == "__main__":
    # --- Attn(method='general') Pallas kernel vs reference -------------------
    def check_attn(B, T, H, block_b=128, compute_dtype=None, tol=2e-3):
        key = jax.random.PRNGKey(0)
        k1, k2, k3 = jax.random.split(key, 3)
        hidden = jax.random.normal(k1, (B, H), dtype=jnp.float32)
        enc = jax.random.normal(k2, (B, T, H), dtype=jnp.float32)
        bound = 1.0 / (H ** 0.5)
        w = jax.random.uniform(k3, (H, H), dtype=jnp.float32,
                               minval=-bound, maxval=bound)
        ctx, alpha = attn_general(hidden, enc, w, block_b=block_b,
                                  compute_dtype=compute_dtype)
        jax.block_until_ready((ctx, alpha))
        ctx_r, alpha_r = attn_general_ref(hidden, enc, w)
        assert ctx.shape == (B, H) and alpha.shape == (B, T)
        assert jnp.allclose(ctx, ctx_r, atol=tol, rtol=tol), "ctx mismatch"
        assert jnp.allclose(alpha, alpha_r, atol=tol, rtol=tol), "alpha mismatch"

    check_attn(2, 8, 32)                                          # demo sizes, f32
    check_attn(20, 96, 64, block_b=8)                             # batch padding + multi-step grid
    check_attn(2, 8, 32, compute_dtype=jnp.bfloat16, tol=5e-2)    # bf16 enc/DMA path

    # --- Full RNNAttnDecoder forward step using the Pallas attention core ----
    B, T, H, V, OUT = 2, 8, 32, 8, 10   # batch, enc length, hidden, vocab, output
    key = jax.random.PRNGKey(0)
    ks = jax.random.split(key, 12)

    encoder_outputs = jax.random.normal(ks[1], (B, T, H), dtype=jnp.float32)
    bound = 1.0 / (H ** 0.5)
    w_attn = jax.random.uniform(ks[2], (H, H), dtype=jnp.float32,
                                minval=-bound, maxval=bound)
    gin = V + H
    params = {
        'embedding': jnp.eye(V, dtype=jnp.float32),     # fixed identity embedding
        'w_ih': jax.random.normal(ks[3], (3 * H, gin), jnp.float32) * 0.1,
        'w_hh': jax.random.normal(ks[4], (3 * H, H), jnp.float32) * 0.1,
        'b_ih': jax.random.normal(ks[5], (3 * H,), jnp.float32) * 0.1,
        'b_hh': jax.random.normal(ks[6], (3 * H,), jnp.float32) * 0.1,
        'w_attn': w_attn,
        'w_wc': jax.random.normal(ks[7], (H, 2 * H), jnp.float32) * 0.1,
        'b_wc': jax.random.normal(ks[8], (H,), jnp.float32) * 0.1,
        'w_ws': jax.random.normal(ks[9], (OUT, H), jnp.float32) * 0.1,
        'b_ws': jax.random.normal(ks[10], (OUT,), jnp.float32) * 0.1,
    }
    token_ids = jax.random.randint(ks[11], (B,), 0, V)
    last_ht = jax.random.normal(ks[0], (B, H), dtype=jnp.float32)
    last_hidden = jax.random.normal(ks[1], (1, B, H), dtype=jnp.float32)

    out = rnn_attn_decoder_forward(params, token_ids, last_ht, last_hidden,
                                   encoder_outputs)
    jax.block_until_ready(out)
    out_ref = rnn_attn_decoder_forward(
        params, token_ids, last_ht, last_hidden, encoder_outputs,
        attn_fn=lambda h, e, w: attn_general_ref(h, e, w))
    assert out[0].shape == (B, OUT) and out[1].shape == (B, H)
    assert out[2].shape == (1, B, H) and out[3].shape == (B, T)
    for a, b in zip(out, out_ref):
        assert jnp.allclose(a, b, atol=2e-3, rtol=2e-3)

    print("KERNEL_OK")
</pallas_src>

<mosaic_0001>
module attributes {stable_mosaic.version = 11 : i64} {
  func.func @_attn_kernel(%arg0: i32, %arg1: memref<2x1x32xf32, #tpu.memory_space<vmem>>, %arg2: memref<2x8x32xf32, #tpu.memory_space<vmem>>, %arg3: memref<2x1x32xf32, #tpu.memory_space<vmem>>, %arg4: memref<2x8x1xf32, #tpu.memory_space<vmem>>) attributes {dimension_semantics = [#tpu.dimension_semantics<parallel>], iteration_bounds = array<i64: 1>, scalar_prefetch = 0 : i64, scratch_operands = 0 : i64, tpu.core_type = #tpu.core_type<tc>, window_params = [{transform_indices = @transform_0, window_bounds = array<i64: 2, 1, 32>}, {transform_indices = @transform_1, window_bounds = array<i64: 2, 8, 32>}, {transform_indices = @transform_2, window_bounds = array<i64: 2, 1, 32>}, {transform_indices = @transform_3, window_bounds = array<i64: 2, 8, 1>}]} {
    %c0 = arith.constant 0 : index
    %c0_0 = arith.constant 0 : index
    %c0_1 = arith.constant 0 : index
    %0 = vector.load %arg1[%c0, %c0_0, %c0_1] : memref<2x1x32xf32, #tpu.memory_space<vmem>>, vector<2x1x32xf32>
    %c0_2 = arith.constant 0 : index
    %c0_3 = arith.constant 0 : index
    %c0_4 = arith.constant 0 : index
    %1 = vector.load %arg2[%c0_2, %c0_3, %c0_4] : memref<2x8x32xf32, #tpu.memory_space<vmem>>, vector<2x8x32xf32>
    %2 = vector.broadcast %0 : vector<2x1x32xf32> to vector<2x8x32xf32>
    %3 = arith.mulf %2, %1 : vector<2x8x32xf32>
    %cst = arith.constant dense<0.000000e+00> : vector<2x8xf32>
    %4 = vector.multi_reduction <add>, %3, %cst [2] : vector<2x8x32xf32> to vector<2x8xf32>
    %5 = vector.shape_cast %4 : vector<2x8xf32> to vector<2x8x1xf32>
    %cst_5 = arith.constant dense<0xFF800000> : vector<2x1xf32>
    %6 = vector.multi_reduction <maximumf>, %5, %cst_5 [1] : vector<2x8x1xf32> to vector<2x1xf32>
    %7 = vector.shape_cast %6 : vector<2x1xf32> to vector<2x1x1xf32>
    %8 = vector.broadcast %7 : vector<2x1x1xf32> to vector<2x8x1xf32>
    %9 = arith.subf %5, %8 : vector<2x8x1xf32>
    %10 = math.exp %9 : vector<2x8x1xf32>
    %cst_6 = arith.constant dense<0.000000e+00> : vector<2x1xf32>
    %11 = vector.multi_reduction <add>, %10, %cst_6 [1] : vector<2x8x1xf32> to vector<2x1xf32>
    %12 = vector.shape_cast %11 : vector<2x1xf32> to vector<2x1x1xf32>
    %13 = tpu.reciprocal %12 {approx = true} : vector<2x1x1xf32> -> vector<2x1x1xf32>
    %14 = vector.broadcast %13 : vector<2x1x1xf32> to vector<2x8x1xf32>
    %15 = arith.mulf %10, %14 : vector<2x8x1xf32>
    %c0_7 = arith.constant 0 : index
    %c0_8 = arith.constant 0 : index
    %c0_9 = arith.constant 0 : index
    %16 = vector.load %arg4[%c0_7, %c0_8, %c0_9] : memref<2x8x1xf32, #tpu.memory_space<vmem>>, vector<2x8x1xf32>
    tpu.vector_store %arg4[%c0_7, %c0_8, %c0_9], %15 {strides = array<i32>} : memref<2x8x1xf32, #tpu.memory_space<vmem>>, vector<2x8x1xf32>,
    %17 = vector.broadcast %15 : vector<2x8x1xf32> to vector<2x8x32xf32>
    %18 = arith.mulf %17, %1 : vector<2x8x32xf32>
    %cst_10 = arith.constant dense<0.000000e+00> : vector<2x32xf32>
    %19 = vector.multi_reduction <add>, %18, %cst_10 [1] : vector<2x8x32xf32> to vector<2x32xf32>
    %20 = vector.shape_cast %19 : vector<2x32xf32> to vector<2x1x32xf32>
    %c0_11 = arith.constant 0 : index
    %c0_12 = arith.constant 0 : index
    %c0_13 = arith.constant 0 : index
    %21 = vector.load %arg3[%c0_11, %c0_12, %c0_13] : memref<2x1x32xf32, #tpu.memory_space<vmem>>, vector<2x1x32xf32>
    tpu.vector_store %arg3[%c0_11, %c0_12, %c0_13], %20 {strides = array<i32>} : memref<2x1x32xf32, #tpu.memory_space<vmem>>, vector<2x1x32xf32>,
    return
  }
  func.func @transform_0(%arg0: i32) -> (i32, i32, i32) {
    %c0_i32 = arith.constant 0 : i32
    %c0_i32_0 = arith.constant 0 : i32
    %c0_i32_1 = arith.constant 0 : i32
    return %arg0, %c0_i32, %c0_i32_0 : i32, i32, i32
  }
  func.func @transform_1(%arg0: i32) -> (i32, i32, i32) {
    %c0_i32 = arith.constant 0 : i32
    %c0_i32_0 = arith.constant 0 : i32
    %c0_i32_1 = arith.constant 0 : i32
    return %arg0, %c0_i32, %c0_i32_0 : i32, i32, i32
  }
  func.func @transform_2(%arg0: i32) -> (i32, i32, i32) {
    %c0_i32 = arith.constant 0 : i32
    %c0_i32_0 = arith.constant 0 : i32
    %c0_i32_1 = arith.constant 0 : i32
    return %arg0, %c0_i32, %c0_i32_0 : i32, i32, i32
  }
  func.func @transform_3(%arg0: i32) -> (i32, i32, i32) {
    %c0_i32 = arith.constant 0 : i32
    %c0_i32_0 = arith.constant 0 : i32
    %c0_i32_1 = arith.constant 0 : i32
    return %arg0, %c0_i32, %c0_i32_0 : i32, i32, i32
  }
}

</mosaic_0001>

<bundles_post_ra>
// kernel: tpu_custom_call.1
= control target key start
LH: loop header
LB: loop body
LE: loop exit
PB: predicated region body
PF: predicated region fallthrough
CT: control target
= control target key end

     0   :  { %9 = vsyncpa [#allocation3], 0  ;;  %s313_s0 = inlined_call_operand.hbm [shape: f32[2,1,32], index: 0, kind: input, shape index: {}]   ;;  %s314_s1 = inlined_call_operand.hbm [shape: f32[2,8,32], index: 1, kind: input, shape index: {}]   ;;  %s315_s2 = inlined_call_operand.hbm [shape: f32[2,1,32], index: 2, kind: output, shape index: {0}]   ;;  %s316_s3 = inlined_call_operand.vmem [shape: f32[2,8,1], index: 3, kind: output, shape index: {1}]  }
   0x1   :  { %10 = vsyncpa [#allocation6], 0 }
   0x2   :  { %11 = vsyncpa [#allocation4], 0  ;;  %s234_s12 = smov [#allocation2]   ;;  %s162_s16 = scalar_lea.hbm %s313_s0, 32 }
   0x3   :  { %s17_s13 = sshll.u32 %s234_s12, 4  ;;  %p163_p0 = scmp.ne.s32.totalorder %s313_s0, %s162_s16  ;;  %s18_s13 = int_to_ptr.vmem [resolvable:$true] %s17_s13 }
   0x4   :  { %p166_p1 = scmp.lt.u32.totalorder %s162_s16, %s313_s0 }
   0x6   :  { %p168_p2 = pnand %p166_p1, %p163_p0 }
   0x8   :  { %171 = shalt.err (!%p168_p2)
}
   0x9   :  { %s172_s21 = scalar_lea.vmem %s18_s13, 32  ;;  %p177_p4 = scmp.lt.s32.totalorder %s18_s13, %s18_s13 }
   0xa   :  { %p173_p3 = scmp.ne.s32.totalorder %s18_s13, %s172_s21  ;;  %p178_p5 = scmp.lt.s32.totalorder %s172_s21, %s172_s21 }
   0xc   :  { %p179_p6 = por %p178_p5, %p177_p4 }
   0xe   :  { %p180_p7 = pnand %p179_p6, %p173_p3 }
  0x10   :  { %183 = shalt.err (!%p180_p7)
}
  0x11   :  { %s235_s22 = smov 16   ;;  %s236_s23 = smov 1  }
  0x12   :  { %23 = dma.hbm_to_vmem [thread:$0]  %s313_s0, 32, %s18_s13, [#allocation3], %s235_s22, %s235_s22, %s236_s23  }
  0x13   :  { %s237_s26 = smov [#allocation5]   ;;  %s184_s30 = scalar_lea.hbm %s314_s1, 256 }
  0x14   :  { %s29_s27 = sshll.u32 %s237_s26, 4  ;;  %p185_p8 = scmp.ne.s32.totalorder %s314_s1, %s184_s30  ;;  %s30_s27 = int_to_ptr.vmem [resolvable:$true] %s29_s27 }
  0x15   :  { %p188_p9 = scmp.lt.u32.totalorder %s184_s30, %s314_s1 }
  0x17   :  { %p190_p10 = pnand %p188_p9, %p185_p8 }
  0x19   :  { %193 = shalt.err (!%p190_p10)
}
  0x1a   :  { %s194_s8 = scalar_lea.vmem %s30_s27, 256  ;;  %p199_p12 = scmp.lt.s32.totalorder %s30_s27, %s30_s27 }
  0x1b   :  { %p195_p11 = scmp.ne.s32.totalorder %s30_s27, %s194_s8  ;;  %p200_p13 = scmp.lt.s32.totalorder %s194_s8, %s194_s8 }
  0x1d   :  { %p201_p0 = por %p200_p13, %p199_p12 }
  0x1f   :  { %p202_p1 = pnand %p201_p0, %p195_p11 }
  0x21   :  { %205 = shalt.err (!%p202_p1)
}
  0x22   :  { %s238_s0 = smov 128   ;;  %s239_s9 = smov 8  }
  0x23   :  { %35 = dma.hbm_to_vmem [thread:$0]  %s314_s1, 256, %s30_s27, [#allocation6], %s238_s0, %s238_s0, %s239_s9  }
  0x24   :  { %228 = dma.done.wait [#allocation3], 32  }
  0x25   :  { %229 = vsyncadd [#allocation3], 4294967264 }
  0x26   :  { %230 = dma.done.wait [#allocation6], 256  }
  0x27   :  { %231 = vsyncadd [#allocation6], 4294967040  ;;  %v145_v0 = vld [vmem:[#allocation2] ss:$0 sm:$0xff]  ;;  %v44_v1 = vld [vmem:[#allocation5] sm:$0xff]  ;;  %vm60_vm0 = vcmask 261120  }
  0x28   :  { %v146_v2 = vld [vmem:[#allocation2 + $0x1] ss:$0 sm:$0xff]  ;;  %v58_v3 = vmul.f32 %v145_v0, %v44_v1  ;;  %v45_v4 = vld [vmem:[#allocation5 + $0x8] sm:$0xff]  ;;  %vm101_vm1 = vcmask 7168   ;;  %vm120_vm2 = vcmask 253952   ;;  %s240_s15 = smov [#allocation7]  }
  0x29   :  { %v59_v5 = vmul.f32 %v146_v2, %v45_v4  ;;  %s128_s16 = sshll.u32 %s240_s15, 4  ;;  %s129_s16 = int_to_ptr.vmem [resolvable:$true] %s128_s16 }
  0x2a   :  { %v61_v6 = vsel %vm60_vm0, %v58_v3, 0.0  ;;  %p211_p3 = scmp.lt.s32.totalorder %s129_s16, %s129_s16 }
  0x2b   :  { %62 = vadd.xlane.f32.xlu0 %v61_v6  ;;  %v64_v7 = vsel %vm60_vm0, %v59_v5, 0.0 }
  0x2f   :  { %65 = vadd.xlane.f32.xlu0 %v64_v7 }
  0xb8   :  { %v63_v8 = vpop.xlane.xlu0 %62 }
  0xb9   :  { %v67_v9 = vrot.slane %v63_v8, 4 }
  0xbb   :  { %v68_v10 = vmax.f32 %v63_v8, %v67_v9 }
  0xbc   :  { %v66_v11 = vpop.xlane.xlu0 %65 }
  0xbd   :  { %v69_v12 = vrot.slane %v68_v10, 2  ;;  %v73_v13 = vrot.slane %v66_v11, 4 }
  0xbf   :  { %v70_v14 = vmax.f32 %v68_v10, %v69_v12  ;;  %v74_v15 = vmax.f32 %v66_v11, %v73_v13 }
  0xc1   :  { %v71_v16 = vrot.slane %v70_v14, 1  ;;  %v75_v17 = vrot.slane %v74_v15, 2 }
  0xc3   :  { %v72_v18 = vmax.f32 %v70_v14, %v71_v16  ;;  %v76_v19 = vmax.f32 %v74_v15, %v75_v17 }
  0xc5   :  { %v79_v20 = vsub.f32 %v63_v8, %v72_v18  ;;  %v77_v21 = vrot.slane %v76_v19, 1 }
  0xc7   :  { %v81_v22 = vmul.f32 1.442695, %v79_v20  ;;  %v78_v23 = vmax.f32 %v76_v19, %v77_v21 }
  0xc9   :  { %154 = vpow2.f32 %v81_v22  ;;  %v80_v24 = vsub.f32 %v66_v11, %v78_v23 }
  0xcb   :  { %v83_v25 = vmul.f32 1.442695, %v80_v24 }
  0xcd   :  { %156 = vpow2.f32 %v83_v25 }
  0xd3   :  { %v155_v26 = vpop.eup %154 }
  0xd4   :  { %v85_v27 = vrot.slane %v155_v26, 4 }
  0xd6   :  { %v86_v28 = vadd.f32 %v155_v26, %v85_v27 }
  0xd7   :  { %v157_v29 = vpop.eup %156 }
  0xd8   :  { %v87_v30 = vrot.slane %v86_v28, 2  ;;  %v91_v31 = vrot.slane %v157_v29, 4 }
  0xda   :  { %v92_v32 = vadd.f32 %v157_v29, %v91_v31  ;;  %v88_v33 = vadd.f32 %v87_v30, %v86_v28 }
  0xdc   :  { %v93_v34 = vrot.slane %v92_v32, 2  ;;  %v89_v35 = vrot.slane %v88_v33, 1 }
  0xde   :  { %v94_v36 = vadd.f32 %v93_v34, %v92_v32  ;;  %v90_v37 = vadd.f32 %v89_v35, %v88_v33 }
  0xe0   :  { %v95_v38 = vrot.slane %v94_v36, 1  ;;  %158 = vrcp.f32 %v90_v37 }
  0xe2   :  { %v96_v39 = vadd.f32 %v95_v38, %v94_v36 }
  0xe4   :  { %160 = vrcp.f32 %v96_v39 }
  0xea   :  { %v159_v40 = vpop.eup %158 }
  0xeb   :  { %v99_v41 = vmul.f32 %v159_v40, %v155_v26 }
  0xed   :  { %102 = vst.msk [vmem:[%s316_s3] sm:$0xff] %vm101_vm1, %v99_v41  ;;  %v104_v42 = vmul.f32 %v99_v41, %v44_v1 }
  0xee   :  { %v161_v43 = vpop.eup %160 }
  0xef   :  { %v100_v44 = vmul.f32 %v161_v43, %v157_v29  ;;  %v106_v45 = vsel %vm60_vm0, %v104_v42, 0.0 }
  0xf0   :  { %v107_v46 = vrot.slane %v106_v45, 4 }
  0xf1   :  { %103 = vst.msk [vmem:[%s316_s3 + $0x8] sm:$0xff] %vm101_vm1, %v100_v44  ;;  %v105_v47 = vmul.f32 %v100_v44, %v45_v4  ;;  %s206_s3 = scalar_lea.vmem %s129_s16, 32 }
  0xf2   :  { %v108_v48 = vadd.f32 %v107_v46, %v106_v45  ;;  %p207_p2 = scmp.ne.s32.totalorder %s129_s16, %s206_s3  ;;  %p212_p4 = scmp.lt.s32.totalorder %s206_s3, %s206_s3 }
  0xf3   :  { %v113_v49 = vsel %vm60_vm0, %v105_v47, 0.0 }
  0xf4   :  { %v109_v50 = vrot.slane %v108_v48, 2  ;;  %v114_v51 = vrot.slane %v113_v49, 4  ;;  %p213_p5 = por %p212_p4, %p211_p3 }
  0xf6   :  { %v110_v52 = vadd.f32 %v109_v50, %v108_v48  ;;  %v115_v53 = vadd.f32 %v114_v51, %v113_v49  ;;  %p214_p6 = pnand %p213_p5, %p207_p2 }
  0xf8   :  { %v111_v54 = vrot.slane %v110_v52, 1  ;;  %v116_v55 = vrot.slane %v115_v53, 2 }
  0xfa   :  { %v112_v56 = vadd.f32 %v111_v54, %v110_v52  ;;  %v117_v57 = vadd.f32 %v116_v55, %v115_v53 }
  0xfc   :  { %v118_v58 = vrot.slane %v117_v57, 1  ;;  %121 = vst.msk [vmem:[#allocation7] sm:$0x1] %vm120_vm2, %v112_v56 }
  0xfe   :  { %v119_v59 = vadd.f32 %v118_v58, %v117_v57 }
 0x100   :  { %122 = vst.msk [vmem:[#allocation7 + $0x1] sm:$0x1] %vm120_vm2, %v119_v59 }
 0x101   :  { %217 = shalt.err (!%p214_p6)
}
 0x102   :  { %s218_s19 = scalar_lea.hbm %s315_s2, 32 }
 0x103   :  { %p219_p7 = scmp.ne.s32.totalorder %s315_s2, %s218_s19  ;;  %p222_p8 = scmp.lt.u32.totalorder %s218_s19, %s315_s2 }
 0x105   :  { %p224_p9 = pnand %p222_p8, %p219_p7 }
 0x107   :  { %227 = shalt.err (!%p224_p9)
}
 0x108   :  { %134 = dma.vmem_to_hbm [thread:$0]  %s129_s16, 32, %s315_s2, [#allocation4], %s235_s22, %s235_s22, %s236_s23  }
 0x109   :  { %232 = dma.done.wait [#allocation4], 32  }
 0x10a   :  { %233 = vsyncadd [#allocation4], 4294967264 }
 0x10b   :  { %142 = vsyncpa [#allocation3], 1 }
 0x10c   :  { %143 = vsyncpa [#allocation6], 1 }
 0x10d   :  { %144 = vsyncpa [#allocation4], 1 }

</bundles_post_ra>
